<compile_context>
chip_gen: v7x
topology: tpu7x:2x2x1
jax: 0.10.0
libtpu: 0.0.40
codegen_flags: <defaults>
</compile_context>

<pallas_src>
import functools

import jax
import jax.numpy as jnp
from jax import lax
from jax.experimental import pallas as pl
from jax.experimental.pallas import tpu as pltpu


def _round_up(n, m):
    return ((n + m - 1) // m) * m


def _vmem_budget_bytes():
    """Per-core VMEM budget with headroom, derived from the actual chip generation."""
    cap = 128 * 1024 * 1024
    try:
        info = pltpu.get_tpu_info()
        cap = int(getattr(info, "vmem_capacity_bytes", cap))
    except Exception:
        pass
    if cap <= 64 * 1024 * 1024:                       # v7x: 64 MiB physical per TC
        return 56 * 1024 * 1024
    return min(100 * 1024 * 1024, cap - 28 * 1024 * 1024)   # v5e / v6e: 128 MiB physical


def _gelu_exact(h):
    # Exact (erf-based) GELU, matching torch.nn.GELU() default numerics.
    return 0.5 * h * (1.0 + lax.erf(h * 0.7071067811865476))


# ---------------------------------------------------------------------------
# Resident-weight kernel: grid = (token tiles,); W1/W2/b1/b2 stay in VMEM and the
# D_c reduction is an in-kernel chunk loop over pl.ds slices of the resident refs.
# ---------------------------------------------------------------------------
def _resident_kernel(x_ref, w1_ref, b1_ref, w2_ref, b2_ref, o_ref, *maybe_acc,
                     td, n_chunks):
    x = x_ref[...]

    def chunk(d):
        off = d * td
        if not isinstance(off, int):
            off = pl.multiple_of(off, td)
        h = jnp.dot(x, w1_ref[:, pl.ds(off, td)],
                    preferred_element_type=jnp.float32)
        h = h + b1_ref[:, pl.ds(off, td)].astype(jnp.float32)
        h = _gelu_exact(h)
        return jnp.dot(h.astype(w2_ref.dtype), w2_ref[pl.ds(off, td), :],
                       preferred_element_type=jnp.float32)

    b2 = b2_ref[...].astype(jnp.float32)

    if n_chunks == 1:
        # Degenerate reduction: no accumulator scratch, write straight to the output.
        o_ref[...] = (chunk(0) + b2).astype(o_ref.dtype)
        return

    acc_ref = maybe_acc[0]
    acc_ref[...] = chunk(0)                 # first chunk writes directly (no zero-fill)

    if n_chunks <= 8:
        # Static offsets -> zero-cost ref views.
        for d in range(1, n_chunks):
            acc_ref[...] += chunk(d)
    else:
        def body(d, carry):
            acc_ref[...] += chunk(d)
            return carry
        lax.fori_loop(1, n_chunks, body, 0)

    o_ref[...] = (acc_ref[...] + b2).astype(o_ref.dtype)


# ---------------------------------------------------------------------------
# Streaming fallback kernel: grid = (token tiles, D_c chunks); weights are streamed
# per chunk, f32 accumulator resident across the "arbitrary" d axis.
# ---------------------------------------------------------------------------
def _streaming_kernel(x_ref, w1_ref, b1_ref, w2_ref, b2_ref, o_ref, acc_ref):
    d = pl.program_id(1)

    h = jnp.dot(x_ref[...], w1_ref[...], preferred_element_type=jnp.float32)
    h = h + b1_ref[...].astype(jnp.float32)
    h = _gelu_exact(h)
    contrib = jnp.dot(h.astype(w2_ref.dtype), w2_ref[...],
                      preferred_element_type=jnp.float32)

    @pl.when(d == 0)
    def _():
        acc_ref[...] = contrib              # skip the separate zero-fill pass

    @pl.when(d > 0)
    def _():
        acc_ref[...] += contrib

    @pl.when(d == pl.num_programs(1) - 1)
    def _():
        o_ref[...] = (acc_ref[...] + b2_ref[...].astype(jnp.float32)).astype(o_ref.dtype)


def channel_mixing_block(x, w1, b1, w2, b2, *, force_streaming=False):
    """x: (B, S, C). w1: (C, D_c), b1: (D_c,), w2: (D_c, C), b2: (C,).

    w1/w2 are the transposed [in, out] layout of torch nn.Linear weights.
    """
    B, S, C = x.shape
    D_c = w1.shape[1]
    N = B * S

    xb = x.dtype.itemsize
    wb = w1.dtype.itemsize
    ob = xb

    # Lane-dense padding (multiples of 128).
    C_p = _round_up(C, 128)
    D_p = _round_up(D_c, 128)

    budget = _vmem_budget_bytes()
    headroom = 4 << 20
    N_cap = _round_up(N, 128)               # smallest MXU/lane-friendly tile covering N

    def pick_td(limit):
        for cand in (512, 384, 256, 128):
            if cand <= limit and D_p % cand == 0:
                return cand
        return 128

    # ---- Preferred: resident weights (single weight DMA for the whole call). ----
    resident_cfg = None
    if not force_streaming:
        td_r = pick_td(512)
        # 2x buffering safety for the weight specs even though their index is constant.
        w_bytes = 2 * wb * (2 * C_p * D_p + D_p + C_p)
        for tm_cand in (512, 256, 128):
            tm_eff = _round_up(min(tm_cand, N_cap), 128)
            n_chunks = D_p // td_r
            acc_bytes = tm_eff * C_p * 4 if n_chunks > 1 else 0
            needed = w_bytes + 2 * tm_eff * C_p * (xb + ob) + acc_bytes + headroom
            if needed <= budget:
                resident_cfg = (tm_eff, td_r, n_chunks)
                break

    # ---- Fallback: stream weight chunks over a second grid axis with a big token tile. ----
    streaming_cfg = None
    if resident_cfg is None:
        for tm_cand in (1024, 512, 256, 128):
            tm_eff = _round_up(min(tm_cand, N_cap), 128)
            for td_cand in (512, 384, 256, 128):
                if D_p % td_cand:
                    continue
                needed = (2 * tm_eff * C_p * (xb + ob)
                          + 2 * wb * (C_p * td_cand + td_cand + td_cand * C_p + C_p)
                          + tm_eff * C_p * 4 + headroom)
                if needed <= budget:
                    streaming_cfg = (tm_eff, td_cand)
                    break
            if streaming_cfg is not None:
                break
        if streaming_cfg is None:
            streaming_cfg = (128, 128)

    tm = resident_cfg[0] if resident_cfg is not None else streaming_cfg[0]
    N_p = _round_up(N, tm)
    n_token_tiles = N_p // tm

    # Pad everything to lane-dense / tile-aligned shapes (sliced off at the end).
    x2 = x.reshape(N, C)
    if (N_p, C_p) != (N, C):
        x2 = jnp.pad(x2, ((0, N_p - N), (0, C_p - C)))
    w1p = jnp.pad(w1, ((0, C_p - C), (0, D_p - D_c)))
    b1p = jnp.pad(b1, ((0, D_p - D_c),)).reshape(1, D_p)
    w2p = jnp.pad(w2, ((0, D_p - D_c), (0, C_p - C)))
    b2p = jnp.pad(b2, ((0, C_p - C),)).reshape(1, C_p)

    out_shape = jax.ShapeDtypeStruct((N_p, C_p), x.dtype)
    vmem_limit = int(budget)

    if resident_cfg is not None:
        tm, td, n_chunks = resident_cfg
        weight_bytes = wb * (2 * C_p * D_p + C_p + D_p)          # read exactly once
        cost = pl.CostEstimate(
            flops=4 * N_p * C_p * D_p,
            transcendentals=N_p * D_p,
            bytes_accessed=xb * N_p * C_p + ob * N_p * C_p + weight_bytes,
        )
        kernel = functools.partial(_resident_kernel, td=td, n_chunks=n_chunks)
        scratch = [pltpu.VMEM((tm, C_p), jnp.float32)] if n_chunks > 1 else []
        out = pl.pallas_call(
            kernel,
            out_shape=out_shape,
            grid_spec=pltpu.PrefetchScalarGridSpec(
                num_scalar_prefetch=0,
                grid=(n_token_tiles,),
                in_specs=[
                    pl.BlockSpec((tm, C_p), lambda i: (i, 0)),    # x tile
                    pl.BlockSpec((C_p, D_p), lambda i: (0, 0)),   # W1 resident
                    pl.BlockSpec((1, D_p), lambda i: (0, 0)),     # b1 resident
                    pl.BlockSpec((D_p, C_p), lambda i: (0, 0)),   # W2 resident
                    pl.BlockSpec((1, C_p), lambda i: (0, 0)),     # b2 resident
                ],
                out_specs=pl.BlockSpec((tm, C_p), lambda i: (i, 0)),
                scratch_shapes=scratch,
            ),
            compiler_params=pltpu.CompilerParams(
                dimension_semantics=("parallel",),
                vmem_limit_bytes=vmem_limit,
            ),
            cost_estimate=cost,
        )(x2, w1p, b1p, w2p, b2p)
    else:
        tm, td = streaming_cfg
        weight_bytes = n_token_tiles * wb * (2 * C_p * D_p + C_p + D_p)  # re-streamed per tile
        cost = pl.CostEstimate(
            flops=4 * N_p * C_p * D_p,
            transcendentals=N_p * D_p,
            bytes_accessed=xb * N_p * C_p + ob * N_p * C_p + weight_bytes,
        )
        out = pl.pallas_call(
            _streaming_kernel,
            out_shape=out_shape,
            grid_spec=pltpu.PrefetchScalarGridSpec(
                num_scalar_prefetch=0,
                grid=(n_token_tiles, D_p // td),
                in_specs=[
                    pl.BlockSpec((tm, C_p), lambda i, d: (i, 0)),   # x tile (resident over d)
                    pl.BlockSpec((C_p, td), lambda i, d: (0, d)),   # W1 chunk
                    pl.BlockSpec((1, td), lambda i, d: (0, d)),     # b1 chunk
                    pl.BlockSpec((td, C_p), lambda i, d: (d, 0)),   # W2 chunk
                    pl.BlockSpec((1, C_p), lambda i, d: (0, 0)),    # b2
                ],
                out_specs=pl.BlockSpec((tm, C_p), lambda i, d: (i, 0)),
                scratch_shapes=[pltpu.VMEM((tm, C_p), jnp.float32)],
            ),
            compiler_params=pltpu.CompilerParams(
                dimension_semantics=("parallel", "arbitrary"),
                vmem_limit_bytes=vmem_limit,
            ),
            cost_estimate=cost,
        )(x2, w1p, b1p, w2p, b2p)

    return out[:N, :C].reshape(B, S, C)


def channel_mixing_ref(x, w1, b1, w2, b2):
    h = jax.nn.gelu(jnp.dot(x, w1) + b1, approximate=False)
    return jnp.dot(h, w2) + b2


def _make_inputs(key, B, S, C, D_c, dtype=jnp.float32):
    kx, k1, k2, k3, k4 = jax.random.split(key, 5)
    x = jax.random.normal(kx, (B, S, C), dtype=dtype)
    # PyTorch nn.Linear default init (uniform +-1/sqrt(fan_in)); weights in (in, out) layout.
    lim1 = 1.0 / jnp.sqrt(jnp.asarray(C, jnp.float32))
    w1 = jax.random.uniform(k1, (C, D_c), minval=-lim1, maxval=lim1, dtype=dtype)
    b1 = jax.random.uniform(k2, (D_c,), minval=-lim1, maxval=lim1, dtype=dtype)
    lim2 = 1.0 / jnp.sqrt(jnp.asarray(D_c, jnp.float32))
    w2 = jax.random.uniform(k3, (D_c, C), minval=-lim2, maxval=lim2, dtype=dtype)
    b2 = jax.random.uniform(k4, (C,), minval=-lim2, maxval=lim2, dtype=dtype)
    return x, w1, b1, w2, b2


if __name__ == "__main__":
    key = jax.random.PRNGKey(0)
    k0, k1, k2 = jax.random.split(key, 3)

    # 1) Small shapes implied by the module (resident path, single D_c chunk).
    x, w1, b1, w2, b2 = _make_inputs(k0, B=2, S=8, C=4, D_c=32)
    out = jax.block_until_ready(channel_mixing_block(x, w1, b1, w2, b2))
    ref = channel_mixing_ref(x, w1, b1, w2, b2)
    assert out.shape == x.shape
    assert jnp.allclose(out, ref, atol=1e-5, rtol=1e-5), "mismatch (small / resident)"

    # 2) Moderate shapes (resident path, multi-chunk in-kernel D_c loop).
    x, w1, b1, w2, b2 = _make_inputs(k1, B=2, S=128, C=256, D_c=1024)
    out = jax.block_until_ready(channel_mixing_block(x, w1, b1, w2, b2))
    ref = channel_mixing_ref(x, w1, b1, w2, b2)
    assert jnp.allclose(out, ref, atol=1e-4, rtol=1e-4), "mismatch (resident multi-chunk)"

    # 3) Streaming fallback path (forced), multi-step accumulation over the d axis.
    x, w1, b1, w2, b2 = _make_inputs(k2, B=2, S=64, C=128, D_c=1024)
    out = jax.block_until_ready(
        channel_mixing_block(x, w1, b1, w2, b2, force_streaming=True))
    ref = channel_mixing_ref(x, w1, b1, w2, b2)
    assert jnp.allclose(out, ref, atol=1e-4, rtol=1e-4), "mismatch (streaming fallback)"

    print("KERNEL_OK")
</pallas_src>

<mosaic_0001>
module attributes {stable_mosaic.version = 11 : i64} {
  func.func @_resident_kernel(%arg0: i32, %arg1: memref<128x128xf32, #tpu.memory_space<vmem>>, %arg2: memref<128x128xf32, #tpu.memory_space<vmem>>, %arg3: memref<1x128xf32, #tpu.memory_space<vmem>>, %arg4: memref<128x128xf32, #tpu.memory_space<vmem>>, %arg5: memref<1x128xf32, #tpu.memory_space<vmem>>, %arg6: memref<128x128xf32, #tpu.memory_space<vmem>>) attributes {dimension_semantics = [#tpu.dimension_semantics<parallel>], iteration_bounds = array<i64: 1>, scalar_prefetch = 0 : i64, scratch_operands = 0 : i64, tpu.core_type = #tpu.core_type<tc>, window_params = [{transform_indices = @transform_0, window_bounds = array<i64: 128, 128>}, {pipeline_mode = #tpu.pipeline_mode<synchronous>, transform_indices = @transform_1, window_bounds = array<i64: 128, 128>}, {pipeline_mode = #tpu.pipeline_mode<synchronous>, transform_indices = @transform_2, window_bounds = array<i64: 1, 128>}, {pipeline_mode = #tpu.pipeline_mode<synchronous>, transform_indices = @transform_3, window_bounds = array<i64: 128, 128>}, {pipeline_mode = #tpu.pipeline_mode<synchronous>, transform_indices = @transform_4, window_bounds = array<i64: 1, 128>}, {transform_indices = @transform_5, window_bounds = array<i64: 128, 128>}]} {
    %c0 = arith.constant 0 : index
    %c0_0 = arith.constant 0 : index
    %0 = vector.load %arg1[%c0, %c0_0] : memref<128x128xf32, #tpu.memory_space<vmem>>, vector<128x128xf32>
    %c0_1 = arith.constant 0 : index
    %c0_2 = arith.constant 0 : index
    %1 = vector.load %arg5[%c0_1, %c0_2] : memref<1x128xf32, #tpu.memory_space<vmem>>, vector<1x128xf32>
    %c0_3 = arith.constant 0 : index
    %c0_4 = arith.constant 0 : index
    %2 = vector.load %arg2[%c0_3, %c0_4] : memref<128x128xf32, #tpu.memory_space<vmem>>, vector<128x128xf32>
    %cst = arith.constant dense<0.000000e+00> : vector<128x128xf32>
    %3 = tpu.matmul %0, %2, %cst {dimension_numbers = #tpu.dot_dimension_numbers<[1], [0], [0], [1], [0, 0, 1, 1], [], []>} : vector<128x128xf32>, vector<128x128xf32>, vector<128x128xf32> -> vector<128x128xf32>
    %c0_5 = arith.constant 0 : index
    %c0_6 = arith.constant 0 : index
    %4 = vector.load %arg3[%c0_5, %c0_6] : memref<1x128xf32, #tpu.memory_space<vmem>>, vector<1x128xf32>
    %5 = vector.broadcast %4 : vector<1x128xf32> to vector<128x128xf32>
    %6 = arith.addf %3, %5 : vector<128x128xf32>
    %cst_7 = arith.constant 5.000000e-01 : f32
    %7 = vector.broadcast %cst_7 : f32 to vector<128x128xf32>
    %8 = arith.mulf %7, %6 : vector<128x128xf32>
    %cst_8 = arith.constant 0.707106769 : f32
    %9 = vector.broadcast %cst_8 : f32 to vector<128x128xf32>
    %10 = arith.mulf %6, %9 : vector<128x128xf32>
    %11 = math.erf %10 : vector<128x128xf32>
    %cst_9 = arith.constant 1.000000e+00 : f32
    %12 = vector.broadcast %cst_9 : f32 to vector<128x128xf32>
    %13 = arith.addf %12, %11 : vector<128x128xf32>
    %14 = arith.mulf %8, %13 : vector<128x128xf32>
    %c0_10 = arith.constant 0 : index
    %c0_11 = arith.constant 0 : index
    %15 = vector.load %arg4[%c0_10, %c0_11] : memref<128x128xf32, #tpu.memory_space<vmem>>, vector<128x128xf32>
    %cst_12 = arith.constant dense<0.000000e+00> : vector<128x128xf32>
    %16 = tpu.matmul %14, %15, %cst_12 {dimension_numbers = #tpu.dot_dimension_numbers<[1], [0], [0], [1], [0, 0, 1, 1], [], []>} : vector<128x128xf32>, vector<128x128xf32>, vector<128x128xf32> -> vector<128x128xf32>
    %17 = vector.broadcast %1 : vector<1x128xf32> to vector<128x128xf32>
    %18 = arith.addf %16, %17 : vector<128x128xf32>
    %c0_13 = arith.constant 0 : index
    %c0_14 = arith.constant 0 : index
    %19 = vector.load %arg6[%c0_13, %c0_14] : memref<128x128xf32, #tpu.memory_space<vmem>>, vector<128x128xf32>
    tpu.vector_store %arg6[%c0_13, %c0_14], %18 {strides = array<i32>} : memref<128x128xf32, #tpu.memory_space<vmem>>, vector<128x128xf32>,
    return
  }
  func.func @transform_0(%arg0: i32) -> (i32, i32) {
    %c0_i32 = arith.constant 0 : i32
    %c0_i32_0 = arith.constant 0 : i32
    return %arg0, %c0_i32 : i32, i32
  }
  func.func @transform_1(%arg0: i32) -> (i32, i32) {
    %c0_i32 = arith.constant 0 : i32
    %c0_i32_0 = arith.constant 0 : i32
    %c0_i32_1 = arith.constant 0 : i32
    return %c0_i32, %c0_i32_0 : i32, i32
  }
  func.func @transform_2(%arg0: i32) -> (i32, i32) {
    %c0_i32 = arith.constant 0 : i32
    %c0_i32_0 = arith.constant 0 : i32
    %c0_i32_1 = arith.constant 0 : i32
    return %c0_i32, %c0_i32_0 : i32, i32
  }
  func.func @transform_3(%arg0: i32) -> (i32, i32) {
    %c0_i32 = arith.constant 0 : i32
    %c0_i32_0 = arith.constant 0 : i32
    %c0_i32_1 = arith.constant 0 : i32
    return %c0_i32, %c0_i32_0 : i32, i32
  }
  func.func @transform_4(%arg0: i32) -> (i32, i32) {
    %c0_i32 = arith.constant 0 : i32
    %c0_i32_0 = arith.constant 0 : i32
    %c0_i32_1 = arith.constant 0 : i32
    return %c0_i32, %c0_i32_0 : i32, i32
  }
  func.func @transform_5(%arg0: i32) -> (i32, i32) {
    %c0_i32 = arith.constant 0 : i32
    %c0_i32_0 = arith.constant 0 : i32
    return %arg0, %c0_i32 : i32, i32
  }
}

</mosaic_0001>

<bundles_post_ra>
// kernel: tpu_custom_call.1
= control target key start
LH: loop header
LB: loop body
LE: loop exit
PB: predicated region body
PF: predicated region fallthrough
CT: control target
= control target key end

     0   :  { %10 = vsyncpa [#allocation3], 0  ;;  %s1133_s0 = inlined_call_operand.hbm [shape: f32[128,128], index: 0, kind: input, shape index: {}]   ;;  %s1134_s1 = inlined_call_operand.hbm [shape: f32[128,128], index: 1, kind: input, shape index: {}]   ;;  %s1135_s2 = inlined_call_operand.hbm [shape: f32[1,128], index: 2, kind: input, shape index: {}]   ;;  %s1136_s3 = inlined_call_operand.hbm [shape: f32[128,128], index: 3, kind: input, shape index: {}]   ;;  %s1137_s4 = inlined_call_operand.hbm [shape: f32[1,128], index: 4, kind: input, shape index: {}]   ;;  %s1138_s5 = inlined_call_operand.hbm [shape: f32[128,128], index: 5, kind: output, shape index: {}]  }
   0x1   :  { %11 = vsyncpa [#allocation6], 0 }
   0x2   :  { %12 = vsyncpa [#allocation9], 0 }
   0x3   :  { %13 = vsyncpa [#allocation4], 0  ;;  %s974_s18 = smov [#allocation5]   ;;  %s975_s20 = smov [#allocation8]  }
   0x4   :  { %s31_s19 = sshll.u32 %s974_s18, 4  ;;  %s53_s21 = sshll.u32 %s975_s20, 4  ;;  %s32_s19 = int_to_ptr.vmem [resolvable:$true] %s31_s19  ;;  %s1012_s21 = int_to_ptr.vmem [resolvable:$true] %s53_s21 }
   0x5   :  { %s834_s24 = scalar_lea.hbm %s1134_s1, 2048 }
   0x6   :  { %p835_p0 = scmp.ne.s32.totalorder %s1134_s1, %s834_s24  ;;  %p838_p1 = scmp.lt.u32.totalorder %s834_s24, %s1134_s1 }
   0x8   :  { %p840_p2 = pnand %p838_p1, %p835_p0 }
   0xa   :  { %843 = shalt.err (!%p840_p2)
}
   0xb   :  { %s844_s29 = scalar_lea.vmem %s32_s19, 2048  ;;  %p849_p4 = scmp.lt.s32.totalorder %s32_s19, %s32_s19 }
   0xc   :  { %p845_p3 = scmp.ne.s32.totalorder %s32_s19, %s844_s29  ;;  %p850_p5 = scmp.lt.s32.totalorder %s844_s29, %s844_s29 }
   0xe   :  { %p851_p6 = por %p850_p5, %p849_p4 }
  0x10   :  { %p852_p7 = pnand %p851_p6, %p845_p3 }
  0x12   :  { %855 = shalt.err (!%p852_p7)
}
  0x13   :  { %s976_s30 = smov 128   ;;  %s977_s6 = smov 8  }
  0x14   :  { %37 = dma.hbm_to_vmem [thread:$0]  %s1134_s1, 2048, %s32_s19, [#allocation6], %s976_s30, %s976_s30, %s977_s6  }
  0x15   :  { %s856_s11 = scalar_lea.hbm %s1136_s3, 2048 }
  0x16   :  { %p857_p8 = scmp.ne.s32.totalorder %s1136_s3, %s856_s11  ;;  %p860_p9 = scmp.lt.u32.totalorder %s856_s11, %s1136_s3 }
  0x18   :  { %p862_p10 = pnand %p860_p9, %p857_p8 }
  0x1a   :  { %865 = shalt.err (!%p862_p10)
}
  0x1b   :  { %s866_s16 = scalar_lea.vmem %s1012_s21, 2048  ;;  %p871_p12 = scmp.lt.s32.totalorder %s1012_s21, %s1012_s21 }
  0x1c   :  { %p867_p11 = scmp.ne.s32.totalorder %s1012_s21, %s866_s16  ;;  %p872_p13 = scmp.lt.s32.totalorder %s866_s16, %s866_s16 }
  0x1e   :  { %p873_p0 = por %p872_p13, %p871_p12 }
  0x20   :  { %p874_p1 = pnand %p873_p0, %p867_p11 }
  0x22   :  { %877 = shalt.err (!%p874_p1)
}
  0x23   :  { %59 = dma.hbm_to_vmem [thread:$0]  %s1136_s3, 2048, %s1012_s21, [#allocation9], %s976_s30, %s976_s30, %s977_s6  }
  0x24   :  { %s978_s18 = smov [#allocation2]   ;;  %s979_s20 = smov [#allocation7]  }
  0x25   :  { %s19_s19 = sshll.u32 %s978_s18, 4  ;;  %s44_s22 = sshll.u32 %s979_s20, 4  ;;  %s20_s19 = int_to_ptr.vmem [resolvable:$true] %s19_s19  ;;  %s45_s22 = int_to_ptr.vmem [resolvable:$true] %s44_s22 }
  0x26   :  { %s878_s25 = scalar_lea.hbm %s1133_s0, 2048 }
  0x27   :  { %p879_p2 = scmp.ne.s32.totalorder %s1133_s0, %s878_s25  ;;  %p882_p3 = scmp.lt.u32.totalorder %s878_s25, %s1133_s0 }
  0x29   :  { %p884_p4 = pnand %p882_p3, %p879_p2 }
  0x2b   :  { %887 = shalt.err (!%p884_p4)
}
  0x2c   :  { %s888_s3 = scalar_lea.vmem %s20_s19, 2048  ;;  %p893_p6 = scmp.lt.s32.totalorder %s20_s19, %s20_s19 }
  0x2d   :  { %p889_p5 = scmp.ne.s32.totalorder %s20_s19, %s888_s3  ;;  %p894_p7 = scmp.lt.s32.totalorder %s888_s3, %s888_s3 }
  0x2f   :  { %p895_p8 = por %p894_p7, %p893_p6 }
  0x31   :  { %p896_p9 = pnand %p895_p8, %p889_p5 }
  0x33   :  { %899 = shalt.err (!%p896_p9)
}
  0x34   :  { %25 = dma.hbm_to_vmem [thread:$0]  %s1133_s0, 2048, %s20_s19, [#allocation3], %s976_s30, %s976_s30, %s977_s6  }
  0x35   :  { %s900_s10 = scalar_lea.hbm %s1135_s2, 16 }
  0x36   :  { %p901_p10 = scmp.ne.s32.totalorder %s1135_s2, %s900_s10  ;;  %p904_p11 = scmp.lt.u32.totalorder %s900_s10, %s1135_s2 }
  0x38   :  { %p906_p12 = pnand %p904_p11, %p901_p10 }
  0x3a   :  { %909 = shalt.err (!%p906_p12)
}
  0x3b   :  { %s910_s15 = scalar_lea.vmem %s45_s22, 16  ;;  %s914_s16 = scalar_lea.vmem %s45_s22, 32 }
  0x3c   :  { %p911_p13 = scmp.ne.s32.totalorder %s45_s22, %s910_s15  ;;  %p915_p0 = scmp.lt.s32.totalorder %s45_s22, %s45_s22 }
  0x3d   :  { %p916_p1 = scmp.lt.s32.totalorder %s914_s16, %s910_s15 }
  0x3f   :  { %p917_p2 = por %p916_p1, %p915_p0 }
  0x41   :  { %p918_p3 = pnand %p917_p2, %p911_p13 }
  0x43   :  { %921 = shalt.err (!%p918_p3)
}
  0x44   :  { %47 = dma.hbm_to_vmem [thread:$0]  %s1135_s2, 16, %s45_s22, [#allocation6]  }
  0x45   :  { %s980_s17 = smov [#allocation10]   ;;  %s922_s23 = scalar_lea.hbm %s1137_s4, 16 }
  0x46   :  { %s66_s18 = sshll.u32 %s980_s17, 4  ;;  %p923_p4 = scmp.ne.s32.totalorder %s1137_s4, %s922_s23  ;;  %s67_s18 = int_to_ptr.vmem [resolvable:$true] %s66_s18 }
  0x47   :  { %p926_p5 = scmp.lt.u32.totalorder %s922_s23, %s1137_s4 }
  0x49   :  { %p928_p6 = pnand %p926_p5, %p923_p4 }
  0x4b   :  { %931 = shalt.err (!%p928_p6)
}
  0x4c   :  { %s932_s28 = scalar_lea.vmem %s67_s18, 16  ;;  %s936_s2 = scalar_lea.vmem %s67_s18, 32 }
  0x4d   :  { %p933_p7 = scmp.ne.s32.totalorder %s67_s18, %s932_s28  ;;  %p937_p8 = scmp.lt.s32.totalorder %s67_s18, %s67_s18 }
  0x4e   :  { %p938_p9 = scmp.lt.s32.totalorder %s936_s2, %s932_s28 }
  0x50   :  { %p939_p10 = por %p938_p9, %p937_p8 }
  0x52   :  { %p940_p11 = pnand %p939_p10, %p933_p7 }
  0x54   :  { %943 = shalt.err (!%p940_p11)
}
  0x55   :  { %69 = dma.hbm_to_vmem [thread:$0]  %s1137_s4, 16, %s67_s18, [#allocation9]  }
  0x56   :  { %966 = dma.done.wait [#allocation3], 2048  }
  0x57   :  { %967 = vsyncadd [#allocation3], 4294965248 }
  0x58   :  { %968 = dma.done.wait [#allocation6], 2064  }
  0x59   :  { %969 = vsyncadd [#allocation6], 4294965232 }
  0x5a   :  { %970 = dma.done.wait [#allocation9], 2064  }
  0x5b   :  { %971 = vsyncadd [#allocation9], 4294965232  ;;  %v102_v0 = vld [vmem:[#allocation5] sm:$0xff]  ;;  %v103_v1 = vld [vmem:[#allocation5 + $0x8] sm:$0xff]  ;;  %s981_s4 = smov [#allocation11]  }
  0x5c   :  { %v104_v2 = vld [vmem:[#allocation5 + $0x10] sm:$0xff]  ;;  %v730_v3 = vpack.c.bf16 %v103_v1, %v102_v0  ;;  %v105_v4 = vld [vmem:[#allocation5 + $0x18] sm:$0xff]  ;;  %v106_v6 = vld [vmem:[#allocation5 + $0x20] sm:$0xff]  ;;  %s538_s3 = sshll.u32 %s981_s4, 4  ;;  %s539_s3 = int_to_ptr.vmem [resolvable:$true] %s538_s3 }
  0x5d   :  { %v734_v5 = vpack.c.bf16 %v105_v4, %v104_v2  ;;  %v107_v7 = vld [vmem:[#allocation5 + $0x28] sm:$0xff]  ;;  %v85_v9 = vld [vmem:[#allocation2] sm:$0xff]  ;;  %v108_v10 = vld [vmem:[#allocation5 + $0x30] sm:$0xff]  ;;  %s944_s21 = scalar_lea.vmem %s539_s3, 2048  ;;  %p949_p13 = scmp.lt.s32.totalorder %s539_s3, %s539_s3 }
  0x5e   :  { %731 = vmatprep.subr.bf16.mxu0 %v730_v3  ;;  %v738_v8 = vpack.c.bf16 %v107_v7, %v106_v6  ;;  %v109_v11 = vld [vmem:[#allocation5 + $0x38] sm:$0xff]  ;;  %650 = vmatprep.mubr.f32.mxu0 %v85_v9  ;;  %v110_v13 = vld [vmem:[#allocation5 + $0x40] sm:$0xff]  ;;  %v111_v14 = vld [vmem:[#allocation5 + $0x48] sm:$0xff]  ;;  %p945_p12 = scmp.ne.s32.totalorder %s539_s3, %s944_s21  ;;  %p950_p0 = scmp.lt.s32.totalorder %s944_s21, %s944_s21 }
  0x5f   :  { %733 = vmatpush3.bf16.msra.mxu0 %v730_v3  ;;  %v742_v12 = vpack.c.bf16 %v109_v11, %v108_v10  ;;  %v350_v15 = vld [vmem:[#allocation8] sm:$0xff]  ;;  %v351_v16 = vld [vmem:[#allocation8 + $0x8] sm:$0xff]  ;;  %v352_v17 = vld [vmem:[#allocation8 + $0x10] sm:$0xff]  ;;  %v746_v21 = vpack.c.bf16 %v111_v14, %v110_v13 }
  0x60   :  { %735 = vmatprep.subr.bf16.mxu0 %v734_v5  ;;  %v353_v18 = vld [vmem:[#allocation8 + $0x18] sm:$0xff]  ;;  %v762_v19 = vpack.c.bf16 %v351_v16, %v350_v15  ;;  %v354_v22 = vld [vmem:[#allocation8 + $0x20] sm:$0xff]  ;;  %v355_v23 = vld [vmem:[#allocation8 + $0x28] sm:$0xff]  ;;  %p951_p1 = por %p950_p0, %p949_p13 }
  0x61   :  { %v766_v20 = vpack.c.bf16 %v353_v18, %v352_v17  ;;  %v112_v24 = vld [vmem:[#allocation5 + $0x50] sm:$0xff]  ;;  %v113_v25 = vld [vmem:[#allocation5 + $0x58] sm:$0xff]  ;;  %v770_v26 = vpack.c.bf16 %v355_v23, %v354_v22  ;;  %v114_v28 = vld [vmem:[#allocation5 + $0x60] sm:$0xff] }
  0x62   :  { %763 = vmatprep.subr.bf16.mxu1 %v762_v19  ;;  %v750_v27 = vpack.c.bf16 %v113_v25, %v112_v24  ;;  %v115_v29 = vld [vmem:[#allocation5 + $0x68] sm:$0xff]  ;;  %v116_v31 = vld [vmem:[#allocation5 + $0x70] sm:$0xff]  ;;  %v117_v32 = vld [vmem:[#allocation5 + $0x78] sm:$0xff]  ;;  %p952_p2 = pnand %p951_p1, %p945_p12 }
  0x63   :  { %737 = vmatpush3.bf16.msra.mxu0 %v734_v5  ;;  %765 = vmatpush3.bf16.msra.mxu1 %v762_v19  ;;  %v754_v30 = vpack.c.bf16 %v115_v29, %v114_v28  ;;  %v758_v33 = vpack.c.bf16 %v117_v32, %v116_v31  ;;  %v86_v34 = vld [vmem:[#allocation2 + $0x8] sm:$0xff]  ;;  %v87_v35 = vld [vmem:[#allocation2 + $0x10] sm:$0xff]  ;;  %v88_v36 = vld [vmem:[#allocation2 + $0x18] sm:$0xff] }
  0x64   :  { %739 = vmatprep.subr.bf16.mxu0 %v738_v8  ;;  %767 = vmatprep.subr.bf16.mxu1 %v766_v20  ;;  %v89_v37 = vld [vmem:[#allocation2 + $0x20] sm:$0xff]  ;;  %v90_v38 = vld [vmem:[#allocation2 + $0x28] sm:$0xff]  ;;  %v91_v39 = vld [vmem:[#allocation2 + $0x30] sm:$0xff] }
  0x65   :  { %v92_v40 = vld [vmem:[#allocation2 + $0x38] sm:$0xff]  ;;  %v93_v41 = vld [vmem:[#allocation2 + $0x40] sm:$0xff]  ;;  %v94_v42 = vld [vmem:[#allocation2 + $0x48] sm:$0xff] }
  0x66   :  { %v95_v43 = vld [vmem:[#allocation2 + $0x50] sm:$0xff]  ;;  %v96_v44 = vld [vmem:[#allocation2 + $0x58] sm:$0xff]  ;;  %v97_v45 = vld [vmem:[#allocation2 + $0x60] sm:$0xff] }
  0x67   :  { %741 = vmatpush3.bf16.msra.mxu0 %v738_v8  ;;  %769 = vmatpush3.bf16.msra.mxu1 %v766_v20  ;;  %v98_v46 = vld [vmem:[#allocation2 + $0x68] sm:$0xff]  ;;  %v99_v47 = vld [vmem:[#allocation2 + $0x70] sm:$0xff]  ;;  %v100_v48 = vld [vmem:[#allocation2 + $0x78] sm:$0xff] }
  0x68   :  { %743 = vmatprep.subr.bf16.mxu0 %v742_v12  ;;  %771 = vmatprep.subr.bf16.mxu1 %v770_v26  ;;  %v356_v49 = vld [vmem:[#allocation8 + $0x30] sm:$0xff]  ;;  %v357_v50 = vld [vmem:[#allocation8 + $0x38] sm:$0xff]  ;;  %v358_v52 = vld [vmem:[#allocation8 + $0x40] sm:$0xff] }
  0x69   :  { %v774_v51 = vpack.c.bf16 %v357_v50, %v356_v49  ;;  %v359_v53 = vld [vmem:[#allocation8 + $0x48] sm:$0xff]  ;;  %v360_v55 = vld [vmem:[#allocation8 + $0x50] sm:$0xff]  ;;  %v361_v56 = vld [vmem:[#allocation8 + $0x58] sm:$0xff] }
  0x6a   :  { %v778_v54 = vpack.c.bf16 %v359_v53, %v358_v52  ;;  %v782_v57 = vpack.c.bf16 %v361_v56, %v360_v55  ;;  %v362_v58 = vld [vmem:[#allocation8 + $0x60] sm:$0xff]  ;;  %v363_v59 = vld [vmem:[#allocation8 + $0x68] sm:$0xff]  ;;  %v364_v61 = vld [vmem:[#allocation8 + $0x70] sm:$0xff] }
  0x6b   :  { %745 = vmatpush3.bf16.msra.mxu0 %v742_v12  ;;  %773 = vmatpush3.bf16.msra.mxu1 %v770_v26  ;;  %v786_v60 = vpack.c.bf16 %v363_v59, %v362_v58  ;;  %v365_v62 = vld [vmem:[#allocation8 + $0x78] sm:$0xff] }
  0x6c   :  { %747 = vmatprep.subr.bf16.mxu0 %v746_v21  ;;  %775 = vmatprep.subr.bf16.mxu1 %v774_v51  ;;  %v790_v63 = vpack.c.bf16 %v365_v62, %v364_v61  ;;  %v1088_v0 = vld [vmem:[#allocation7] ss:$0 sm:$0xff] }
  0x6f   :  { %749 = vmatpush3.bf16.msra.mxu0 %v746_v21  ;;  %777 = vmatpush3.bf16.msra.mxu1 %v774_v51 }
  0x70   :  { %751 = vmatprep.subr.bf16.mxu0 %v750_v27  ;;  %779 = vmatprep.subr.bf16.mxu1 %v778_v54 }
  0x73   :  { %753 = vmatpush3.bf16.msra.mxu0 %v750_v27  ;;  %781 = vmatpush3.bf16.msra.mxu1 %v778_v54 }
  0x74   :  { %755 = vmatprep.subr.bf16.mxu0 %v754_v30  ;;  %783 = vmatprep.subr.bf16.mxu1 %v782_v57 }
  0x77   :  { %757 = vmatpush3.bf16.msra.mxu0 %v754_v30  ;;  %785 = vmatpush3.bf16.msra.mxu1 %v782_v57 }
  0x78   :  { %759 = vmatprep.subr.bf16.mxu0 %v758_v33  ;;  %787 = vmatprep.subr.bf16.mxu1 %v786_v60 }
  0x7b   :  { %761 = vmatpush3.bf16.msra.mxu0 %v758_v33  ;;  %789 = vmatpush3.bf16.msra.mxu1 %v786_v60 }
  0x7c   :  { %791 = vmatprep.subr.bf16.mxu1 %v790_v63 }
  0x7e   :  { %651 = vmatmul.mubr.f32.vlgmr.msra.gmra.mrb[0].mxu0 %v86_v34 }
  0x7f   :  { %653 = vmatprep.mubr.f32.mxu0 %v87_v35  ;;  %793 = vmatpush3.bf16.msra.mxu1 %v790_v63 }
  0x82   :  { %654 = vmatmul.mubr.f32.gmra.mrb[2].mxu0 %v88_v36 }
  0x83   :  { %656 = vmatprep.mubr.f32.mxu0 %v89_v37 }
  0x86   :  { %657 = vmatmul.mubr.f32.gmra.mrb[4].mxu0 %v90_v38 }
  0x87   :  { %659 = vmatprep.mubr.f32.mxu0 %v91_v39 }
  0x8a   :  { %660 = vmatmul.mubr.f32.gmra.mrb[6].mxu0 %v92_v40 }
  0x8b   :  { %662 = vmatprep.mubr.f32.mxu0 %v93_v41 }
  0x8e   :  { %663 = vmatmul.mubr.f32.gmra.mrb[8].mxu0 %v94_v42 }
  0x8f   :  { %665 = vmatprep.mubr.f32.mxu0 %v95_v43 }
  0x92   :  { %666 = vmatmul.mubr.f32.gmra.mrb[10].mxu0 %v96_v44 }
  0x93   :  { %668 = vmatprep.mubr.f32.mxu0 %v97_v45 }
  0x96   :  { %669 = vmatmul.mubr.f32.gmra.mrb[12].mxu0 %v98_v46 }
  0x97   :  { %671 = vmatprep.mubr.f32.mxu0 %v99_v47 }
  0x9a   :  { %672 = vmatmul.mubr.f32.gmra.mrb[14].mxu0 %v100_v48 }
 0x151   :  { %v652_v1 = vpop.f32.mrb[0].mxu0 }
 0x152   :  { %v197_v2 = vadd.f32 %v652_v1, %v1088_v0  ;;  %v191_v3 = vpop.f32.mrb[1].mxu0 }
 0x153   :  { %v192_v4 = vadd.f32 %v1088_v0, %v191_v3 }
 0x154   :  { %v287_v5 = vmul.f32 0.70710677, %v197_v2  ;;  %v271_v33 = vmul.f32 0.5, %v197_v2 }
 0x155   :  { %v286_v6 = vmul.f32 0.70710677, %v192_v4  ;;  %v655_v7 = vpop.f32.mrb[2].mxu0  ;;  %v270_v31 = vmul.f32 0.5, %v192_v4 }
 0x156   :  { %802 = verf.f32 %v287_v5  ;;  %v207_v8 = vadd.f32 %v655_v7, %v1088_v0  ;;  %v201_v9 = vpop.f32.mrb[3].mxu0 }
 0x157   :  { %804 = verf.f32 %v286_v6  ;;  %v202_v10 = vadd.f32 %v1088_v0, %v201_v9 }
 0x158   :  { %v289_v11 = vmul.f32 0.70710677, %v207_v8  ;;  %v273_v47 = vmul.f32 0.5, %v207_v8 }
 0x159   :  { %v288_v12 = vmul.f32 0.70710677, %v202_v10  ;;  %v658_v13 = vpop.f32.mrb[4].mxu0  ;;  %v272_v43 = vmul.f32 0.5, %v202_v10 }
 0x15a   :  { %806 = verf.f32 %v289_v11  ;;  %v217_v14 = vadd.f32 %v658_v13, %v1088_v0  ;;  %v211_v15 = vpop.f32.mrb[5].mxu0 }
 0x15b   :  { %808 = verf.f32 %v288_v12  ;;  %v212_v16 = vadd.f32 %v1088_v0, %v211_v15 }
 0x15c   :  { %v291_v17 = vmul.f32 0.70710677, %v217_v14  ;;  %v275_v61 = vmul.f32 0.5, %v217_v14 }
 0x15d   :  { %v290_v18 = vmul.f32 0.70710677, %v212_v16  ;;  %v661_v19 = vpop.f32.mrb[6].mxu0  ;;  %v274_v57 = vmul.f32 0.5, %v212_v16 }
 0x15e   :  { %810 = verf.f32 %v291_v17  ;;  %v1097_v20 = vadd.f32 %v661_v19, %v1088_v0  ;;  %v221_v21 = vpop.f32.mrb[7].mxu0 }
 0x15f   :  { %812 = verf.f32 %v290_v18  ;;  %v222_v22 = vadd.f32 %v1088_v0, %v221_v21 }
 0x160   :  { %v803_v23 = vpop.eup %802  ;;  %v293_v24 = vmul.f32 0.70710677, %v1097_v20  ;;  %v277_v12 = vmul.f32 0.5, %v1097_v20 }
 0x161   :  { %v805_v25 = vpop.eup %804  ;;  %v319_v26 = vadd.f32 1.0, %v803_v23  ;;  %v292_v27 = vmul.f32 0.70710677, %v222_v22  ;;  %v664_v28 = vpop.f32.mrb[8].mxu0  ;;  %v276_v8 = vmul.f32 0.5, %v222_v22 }
 0x162   :  { %814 = verf.f32 %v293_v24  ;;  %v1102_v29 = vadd.f32 %v664_v28, %v1088_v0  ;;  %v231_v30 = vpop.f32.mrb[9].mxu0  ;;  %v318_v32 = vadd.f32 1.0, %v805_v25 }
 0x163   :  { %816 = verf.f32 %v292_v27  ;;  %v232_v34 = vadd.f32 %v1088_v0, %v231_v30  ;;  %v335_v42 = vmul.f32 %v319_v26, %v271_v33 }
 0x164   :  { %v807_v35 = vpop.eup %806  ;;  %v295_v36 = vmul.f32 0.70710677, %v1102_v29  ;;  %v334_v37 = vmul.f32 %v318_v32, %v270_v31  ;;  %v279_v24 = vmul.f32 0.5, %v1102_v29 }
 0x165   :  { %v809_v38 = vpop.eup %808  ;;  %v321_v39 = vadd.f32 1.0, %v807_v35  ;;  %v294_v40 = vmul.f32 0.70710677, %v232_v34  ;;  %v667_v41 = vpop.f32.mrb[10].mxu0  ;;  %v278_v22 = vmul.f32 0.5, %v232_v34 }
 0x166   :  { %v320_v44 = vadd.f32 1.0, %v809_v38  ;;  %818 = verf.f32 %v295_v36  ;;  %v1107_v45 = vadd.f32 %v667_v41, %v1088_v0  ;;  %v241_v46 = vpop.f32.mrb[11].mxu0  ;;  %706 = vmatprep.mubr.f32.mxu1 %v334_v37 }
 0x167   :  { %820 = verf.f32 %v294_v40  ;;  %v242_v48 = vadd.f32 %v1088_v0, %v241_v46  ;;  %707 = vmatmul.mubr.f32.vlgmr.msra.gmra.mrb[0].mxu1 %v335_v42  ;;  %v337_v56 = vmul.f32 %v321_v39, %v273_v47 }
 0x168   :  { %v811_v49 = vpop.eup %810  ;;  %v297_v50 = vmul.f32 0.70710677, %v1107_v45  ;;  %v336_v51 = vmul.f32 %v320_v44, %v272_v43  ;;  %v281_v31 = vmul.f32 0.5, %v1107_v45 }
 0x169   :  { %v813_v52 = vpop.eup %812  ;;  %v323_v53 = vadd.f32 1.0, %v811_v49  ;;  %v296_v54 = vmul.f32 0.70710677, %v242_v48  ;;  %v670_v55 = vpop.f32.mrb[12].mxu0  ;;  %v280_v28 = vmul.f32 0.5, %v242_v48 }
 0x16a   :  { %v322_v58 = vadd.f32 1.0, %v813_v52  ;;  %822 = verf.f32 %v297_v50  ;;  %v257_v59 = vadd.f32 %v670_v55, %v1088_v0  ;;  %v251_v60 = vpop.f32.mrb[13].mxu0  ;;  %709 = vmatprep.mubr.f32.mxu1 %v336_v51  ;;  %v553_v49 = vld [vmem:[#allocation10] ss:$0 sm:$0xff] }
 0x16b   :  { %824 = verf.f32 %v296_v54  ;;  %v252_v62 = vadd.f32 %v1088_v0, %v251_v60  ;;  %710 = vmatmul.mubr.f32.gmra.mrb[2].mxu1 %v337_v56  ;;  %v339_v7 = vmul.f32 %v323_v53, %v275_v61 }
 0x16c   :  { %v815_v63 = vpop.eup %814  ;;  %v299_v1 = vmul.f32 0.70710677, %v257_v59  ;;  %v338_v2 = vmul.f32 %v322_v58, %v274_v57  ;;  %v283_v38 = vmul.f32 0.5, %v257_v59 }
 0x16d   :  { %v817_v3 = vpop.eup %816  ;;  %v325_v4 = vadd.f32 1.0, %v815_v63  ;;  %v298_v5 = vmul.f32 0.70710677, %v252_v62  ;;  %v673_v6 = vpop.f32.mrb[14].mxu0  ;;  %v282_v37 = vmul.f32 0.5, %v252_v62 }
 0x16e   :  { %v324_v9 = vadd.f32 1.0, %v817_v3  ;;  %826 = verf.f32 %v299_v1  ;;  %v267_v10 = vadd.f32 %v673_v6, %v1088_v0  ;;  %v261_v11 = vpop.f32.mrb[15].mxu0  ;;  %712 = vmatprep.mubr.f32.mxu1 %v338_v2 }
 0x16f   :  { %828 = verf.f32 %v298_v5  ;;  %v262_v13 = vadd.f32 %v1088_v0, %v261_v11  ;;  %713 = vmatmul.mubr.f32.gmra.mrb[4].mxu1 %v339_v7  ;;  %v341_v21 = vmul.f32 %v325_v4, %v277_v12 }
 0x170   :  { %v819_v14 = vpop.eup %818  ;;  %v301_v15 = vmul.f32 0.70710677, %v267_v10  ;;  %v340_v16 = vmul.f32 %v324_v9, %v276_v8  ;;  %v285_v45 = vmul.f32 0.5, %v267_v10 }
 0x171   :  { %v821_v17 = vpop.eup %820  ;;  %v327_v18 = vadd.f32 1.0, %v819_v14  ;;  %v300_v19 = vmul.f32 0.70710677, %v262_v13  ;;  %v284_v44 = vmul.f32 0.5, %v262_v13 }
 0x172   :  { %v326_v23 = vadd.f32 1.0, %v821_v17  ;;  %830 = verf.f32 %v301_v15  ;;  %715 = vmatprep.mubr.f32.mxu1 %v340_v16 }
 0x173   :  { %832 = verf.f32 %v300_v19  ;;  %716 = vmatmul.mubr.f32.gmra.mrb[6].mxu1 %v341_v21  ;;  %v343_v27 = vmul.f32 %v327_v18, %v279_v24 }
 0x174   :  { %v823_v20 = vpop.eup %822  ;;  %v342_v25 = vmul.f32 %v326_v23, %v278_v22 }
 0x175   :  { %v825_v26 = vpop.eup %824  ;;  %v329_v0 = vadd.f32 1.0, %v823_v20 }
 0x176   :  { %v328_v30 = vadd.f32 1.0, %v825_v26  ;;  %718 = vmatprep.mubr.f32.mxu1 %v342_v25 }
 0x177   :  { %719 = vmatmul.mubr.f32.gmra.mrb[8].mxu1 %v343_v27  ;;  %v345_v36 = vmul.f32 %v329_v0, %v281_v31 }
 0x178   :  { %v827_v32 = vpop.eup %826  ;;  %v344_v33 = vmul.f32 %v328_v30, %v280_v28 }
 0x179   :  { %v829_v34 = vpop.eup %828  ;;  %v331_v35 = vadd.f32 1.0, %v827_v32 }
 0x17a   :  { %v330_v29 = vadd.f32 1.0, %v829_v34  ;;  %721 = vmatprep.mubr.f32.mxu1 %v344_v33 }
 0x17b   :  { %722 = vmatmul.mubr.f32.gmra.mrb[10].mxu1 %v345_v36  ;;  %v347_v43 = vmul.f32 %v331_v35, %v283_v38 }
 0x17c   :  { %v831_v39 = vpop.eup %830  ;;  %v346_v40 = vmul.f32 %v330_v29, %v282_v37 }
 0x17d   :  { %v833_v41 = vpop.eup %832  ;;  %v333_v42 = vadd.f32 1.0, %v831_v39 }
 0x17e   :  { %v332_v46 = vadd.f32 1.0, %v833_v41  ;;  %724 = vmatprep.mubr.f32.mxu1 %v346_v40 }
 0x17f   :  { %725 = vmatmul.mubr.f32.gmra.mrb[12].mxu1 %v347_v43  ;;  %v349_v48 = vmul.f32 %v333_v42, %v285_v45 }
 0x180   :  { %v348_v47 = vmul.f32 %v332_v46, %v284_v44 }
 0x182   :  { %727 = vmatprep.mubr.f32.mxu1 %v348_v47 }
 0x183   :  { %728 = vmatmul.mubr.f32.gmra.mrb[14].mxu1 %v349_v48 }
 0x23a   :  { %v708_v50 = vpop.f32.mrb[0].mxu1 }
 0x23b   :  { %v444_v51 = vadd.f32 %v708_v50, %v553_v49  ;;  %v438_v52 = vpop.f32.mrb[1].mxu1 }
 0x23c   :  { %v439_v53 = vadd.f32 %v553_v49, %v438_v52 }
 0x23d   :  { %518 = vst [vmem:[#allocation11 + $0x8] sm:$0xff] %v444_v51 }
 0x23e   :  { %517 = vst [vmem:[#allocation11] sm:$0xff] %v439_v53  ;;  %v711_v54 = vpop.f32.mrb[2].mxu1 }
 0x23f   :  { %v454_v55 = vadd.f32 %v711_v54, %v553_v49  ;;  %v448_v56 = vpop.f32.mrb[3].mxu1 }
 0x240   :  { %v449_v57 = vadd.f32 %v553_v49, %v448_v56 }
 0x241   :  { %520 = vst [vmem:[#allocation11 + $0x18] sm:$0xff] %v454_v55 }
 0x242   :  { %519 = vst [vmem:[#allocation11 + $0x10] sm:$0xff] %v449_v57  ;;  %v714_v58 = vpop.f32.mrb[4].mxu1 }
 0x243   :  { %v464_v59 = vadd.f32 %v714_v58, %v553_v49  ;;  %v458_v60 = vpop.f32.mrb[5].mxu1 }
 0x244   :  { %v459_v61 = vadd.f32 %v553_v49, %v458_v60 }
 0x245   :  { %522 = vst [vmem:[#allocation11 + $0x28] sm:$0xff] %v464_v59 }
 0x246   :  { %521 = vst [vmem:[#allocation11 + $0x20] sm:$0xff] %v459_v61  ;;  %v717_v62 = vpop.f32.mrb[6].mxu1 }
 0x247   :  { %v474_v63 = vadd.f32 %v717_v62, %v553_v49  ;;  %v468_v1 = vpop.f32.mrb[7].mxu1 }
 0x248   :  { %v469_v2 = vadd.f32 %v553_v49, %v468_v1 }
 0x249   :  { %524 = vst [vmem:[#allocation11 + $0x38] sm:$0xff] %v474_v63 }
 0x24a   :  { %523 = vst [vmem:[#allocation11 + $0x30] sm:$0xff] %v469_v2  ;;  %v720_v3 = vpop.f32.mrb[8].mxu1 }
 0x24b   :  { %v484_v4 = vadd.f32 %v720_v3, %v553_v49  ;;  %v478_v5 = vpop.f32.mrb[9].mxu1 }
 0x24c   :  { %v479_v6 = vadd.f32 %v553_v49, %v478_v5 }
 0x24d   :  { %526 = vst [vmem:[#allocation11 + $0x48] sm:$0xff] %v484_v4 }
 0x24e   :  { %525 = vst [vmem:[#allocation11 + $0x40] sm:$0xff] %v479_v6  ;;  %v723_v7 = vpop.f32.mrb[10].mxu1 }
 0x24f   :  { %v494_v8 = vadd.f32 %v723_v7, %v553_v49  ;;  %v488_v9 = vpop.f32.mrb[11].mxu1 }
 0x250   :  { %v489_v10 = vadd.f32 %v553_v49, %v488_v9 }
 0x251   :  { %528 = vst [vmem:[#allocation11 + $0x58] sm:$0xff] %v494_v8 }
 0x252   :  { %527 = vst [vmem:[#allocation11 + $0x50] sm:$0xff] %v489_v10  ;;  %v726_v11 = vpop.f32.mrb[12].mxu1 }
 0x253   :  { %v504_v12 = vadd.f32 %v726_v11, %v553_v49  ;;  %v498_v13 = vpop.f32.mrb[13].mxu1 }
 0x254   :  { %v499_v14 = vadd.f32 %v553_v49, %v498_v13 }
 0x255   :  { %530 = vst [vmem:[#allocation11 + $0x68] sm:$0xff] %v504_v12 }
 0x256   :  { %529 = vst [vmem:[#allocation11 + $0x60] sm:$0xff] %v499_v14  ;;  %v729_v15 = vpop.f32.mrb[14].mxu1 }
 0x257   :  { %v514_v16 = vadd.f32 %v729_v15, %v553_v49  ;;  %v508_v17 = vpop.f32.mrb[15].mxu1 }
 0x258   :  { %v509_v18 = vadd.f32 %v553_v49, %v508_v17 }
 0x259   :  { %532 = vst [vmem:[#allocation11 + $0x78] sm:$0xff] %v514_v16 }
 0x25a   :  { %531 = vst [vmem:[#allocation11 + $0x70] sm:$0xff] %v509_v18 }
 0x25b   :  { %955 = shalt.err (!%p952_p2)
}
 0x25c   :  { %s956_s9 = scalar_lea.hbm %s1138_s5, 2048 }
 0x25d   :  { %p957_p3 = scmp.ne.s32.totalorder %s1138_s5, %s956_s9  ;;  %p960_p4 = scmp.lt.u32.totalorder %s956_s9, %s1138_s5 }
 0x25f   :  { %p962_p5 = pnand %p960_p4, %p957_p3 }
 0x261   :  { %965 = shalt.err (!%p962_p5)
}
 0x262   :  { %544 = dma.vmem_to_hbm [thread:$0]  %s539_s3, 2048, %s1138_s5, [#allocation4], %s976_s30, %s976_s30, %s977_s6  }
 0x263   :  { %972 = dma.done.wait [#allocation4], 2048  }
 0x264   :  { %973 = vsyncadd [#allocation4], 4294965248 }
 0x265   :  { %548 = vsyncpa [#allocation3], 1 }
 0x266   :  { %549 = vsyncpa [#allocation6], 1 }
 0x267   :  { %550 = vsyncpa [#allocation9], 1 }
 0x268   :  { %551 = vsyncpa [#allocation4], 1 }

</bundles_post_ra>
